<compile_context>
chip_gen: v7x
topology: tpu7x:2x2x1
jax: 0.10.0
libtpu: 0.0.40
codegen_flags: <defaults>
</compile_context>

<pallas_src>
import functools

import jax
import jax.numpy as jnp
from jax.experimental import pallas as pl
from jax.experimental.pallas import tpu as pltpu

_EPS = 1e-3  # BatchNorm2d eps used by this backbone


# ----------------------------------------------------------------------------
# Kernel
# ----------------------------------------------------------------------------
def _basic_block_kernel(H, x_ref, w1_ref, s1_ref, t1_ref,
                        w2_ref, s2_ref, t2_ref, out_ref, pad_ref, lhs_ref):
    """One batch-of-images block (grid step) of the residual block.

    x_ref  : (M, WC) f32      M = B*H input rows, lane-dense; also the identity
    w*_ref : (3*WC, WC) bf16  banded conv weights, kh taps stacked along K
    s*_ref : (1, WC) f32      folded BN scale (per-channel, tiled over W)
    t*_ref : (1, WC) f32      folded BN shift + conv bias, tiled over W
    out_ref: (M, WC) f32
    pad_ref: (M+2, WC) f32    halo scratch: one zero row above/below the slab
    lhs_ref: (M, 3*WC) bf16   im2col staging for the fused K=384 matmul
    """
    M, WC = out_ref.shape

    # Row-within-image index; these masks kill cross-image halo bleed inside the
    # batched slab.  They also cover the slab's outer halo rows, so the border
    # rows of pad_ref never reach the matmul un-masked.
    rin = jax.lax.broadcasted_iota(jnp.int32, (M, WC), 0) % H
    not_top = rin != 0          # row has a previous row inside its own image
    not_bot = rin != H - 1      # row has a next row inside its own image

    # Re-zeroed every step: the scratch is per-TensorCore under megacore, so a
    # first-step-only @pl.when guard would leave one core's halo uninitialized.
    zrow = jnp.zeros((1, WC), jnp.float32)
    pad_ref[0:1, :] = zrow
    pad_ref[M + 1:M + 2, :] = zrow

    x = x_ref[...]                                   # (M, WC) f32, identity

    def conv3x3(act, w_ref):
        # act: (M, WC) f32.  The halo scratch provides the +/-1 row shifted
        # views; cross-image rows are zeroed with f32 selects, then each tap is
        # cast to bf16 exactly once into the lane-aligned staging buffer.
        pad_ref[1:M + 1, :] = act
        prev = jnp.where(not_top, pad_ref[0:M, :], 0.0)        # kh = 0 tap
        nxt = jnp.where(not_bot, pad_ref[2:M + 2, :], 0.0)     # kh = 2 tap
        lhs_ref[:, 0:WC] = prev.astype(jnp.bfloat16)
        lhs_ref[:, WC:2 * WC] = act.astype(jnp.bfloat16)       # kh = 1 tap
        lhs_ref[:, 2 * WC:3 * WC] = nxt.astype(jnp.bfloat16)
        # Single (M, 384) @ (384, 128) bf16 MXU matmul, f32 accumulation.
        return jnp.dot(lhs_ref[...], w_ref[...],
                       preferred_element_type=jnp.float32)

    # conv1 (+bias) -> bn1 -> relu          (bias folded into t1)
    h = conv3x3(x, w1_ref)
    h = jnp.maximum(h * s1_ref[...] + t1_ref[...], 0.0)

    # conv2 (+bias) -> bn2
    h2 = conv3x3(h, w2_ref)
    h2 = h2 * s2_ref[...] + t2_ref[...]

    # residual add + relu, single unmasked lane-dense store
    out_ref[...] = jnp.maximum(h2 + x, 0.0)


# ----------------------------------------------------------------------------
# Wrapper
# ----------------------------------------------------------------------------
def _pick_block_batch(N, H, WC):
    """Images per grid step: ~1 MiB f32 input slabs, >= 2 grid steps when N >= 2."""
    target_rows = (1 << 20) // (WC * 4)              # rows per ~1 MiB f32 block
    b = min(N, max(1, target_rows // max(H, 1)))
    if N >= 2:
        b = min(b, N // 2)                           # keep both v7x TCs busy
    while N % b:                                     # grid must tile N exactly
        b -= 1
    return max(b, 1)


def _basic_block_pallas(x_nhwc, kparams):
    N, H, W, C = x_nhwc.shape
    WC = W * C
    assert WC % 128 == 0, "lane-dense layout requires W*C to be a multiple of 128"
    assert H % 8 == 0, "sublane-aligned row slabs require H % 8 == 0"

    w1c, s1, t1, w2c, s2, t2 = kparams
    B = _pick_block_batch(N, H, WC)
    G = N // B
    M = B * H
    x_rows = x_nhwc.reshape(N * H, WC)               # free, contiguous reshape

    # Explicit VMEM budget (sized against v7x's 64 MiB physical VMEM).
    est = 2 * (2 * M * WC * 4)                       # double-buffered f32 in/out blocks
    est += (M + 2) * WC * 4                          # f32 halo scratch
    est += M * 3 * WC * 2                            # bf16 im2col staging
    est += 2 * 2 * (3 * WC * WC * 2)                 # two bf16 weight blocks, 2x buffered
    est += 4 * 2 * (WC * 4)                          # scale/shift blocks
    vmem_limit = min(max(2 * est, 32 << 20), 64 << 20)

    kernel = functools.partial(_basic_block_kernel, H)
    out = pl.pallas_call(
        kernel,
        out_shape=jax.ShapeDtypeStruct((N * H, WC), jnp.float32),
        grid_spec=pltpu.PrefetchScalarGridSpec(
            num_scalar_prefetch=0,
            grid=(G,),
            in_specs=[
                pl.BlockSpec((M, WC), lambda n: (n, 0)),
                pl.BlockSpec((3 * WC, WC), lambda n: (0, 0)),
                pl.BlockSpec((1, WC), lambda n: (0, 0)),
                pl.BlockSpec((1, WC), lambda n: (0, 0)),
                pl.BlockSpec((3 * WC, WC), lambda n: (0, 0)),
                pl.BlockSpec((1, WC), lambda n: (0, 0)),
                pl.BlockSpec((1, WC), lambda n: (0, 0)),
            ],
            out_specs=pl.BlockSpec((M, WC), lambda n: (n, 0)),
            scratch_shapes=[pltpu.VMEM((M + 2, WC), jnp.float32),
                            pltpu.VMEM((M, 3 * WC), jnp.bfloat16)],
        ),
        compiler_params=pltpu.CompilerParams(
            dimension_semantics=("parallel",),
            vmem_limit_bytes=vmem_limit),
    )(x_rows, w1c, s1, t1, w2c, s2, t2)

    return out.reshape(N, H, W, C)


basic_block_pallas = jax.jit(_basic_block_pallas)


# ----------------------------------------------------------------------------
# Parameter construction (PyTorch-style raw params) and kernel-side folding
# ----------------------------------------------------------------------------
def make_raw_params(key, c):
    """Deterministic synthetic params for BasicBlock(inplanes=c, planes=c)."""
    ks = jax.random.split(key, 6)

    def bn(k):
        kg, kb, km, kv = jax.random.split(k, 4)
        gamma = 1.0 + 0.1 * jax.random.normal(kg, (c,), jnp.float32)
        beta = 0.1 * jax.random.normal(kb, (c,), jnp.float32)
        mean = 0.1 * jax.random.normal(km, (c,), jnp.float32)
        var = jnp.abs(jax.random.normal(kv, (c,), jnp.float32)) + 0.5
        return gamma, beta, mean, var

    w1 = 0.1 * jax.random.normal(ks[0], (c, c, 3, 3), jnp.float32)  # OIHW
    b1 = 0.1 * jax.random.normal(ks[1], (c,), jnp.float32)
    g1, be1, m1, v1 = bn(ks[2])
    w2 = 0.1 * jax.random.normal(ks[3], (c, c, 3, 3), jnp.float32)
    b2 = 0.1 * jax.random.normal(ks[4], (c,), jnp.float32)
    g2, be2, m2, v2 = bn(ks[5])
    return dict(w1=w1, b1=b1, g1=g1, be1=be1, m1=m1, v1=v1,
                w2=w2, b2=b2, g2=g2, be2=be2, m2=m2, v2=v2)


def prepare_kernel_params(raw, W):
    """Fold bias+BN into scale/shift; build fused (3*W*C, W*C) bf16 banded weights."""

    def fold(w_oihw, b, gamma, beta, mean, var):
        C = w_oihw.shape[0]
        s = gamma / jnp.sqrt(var + _EPS)
        t = beta - mean * s + b * s                      # exact bias fold
        w_hwio = jnp.transpose(w_oihw, (2, 3, 1, 0))     # (kh, kw, Cin, Cout)
        # Selection tensor S[kw, wi, wo] = 1 iff input col wi feeds output col
        # wo through width tap kw (zero padding in W falls out automatically).
        kw = jnp.arange(3)[:, None, None]
        wi = jnp.arange(W)[None, :, None]
        wo = jnp.arange(W)[None, None, :]
        S = (wi == wo + kw - 1).astype(jnp.float32)      # (3, W, W)
        band = jnp.einsum("kio,hkab->hiaob", S, w_hwio)  # (3, W, Cin, W, Cout)
        # Stack the three kh taps along K -> one (3*W*C, W*C) RHS per conv.
        # TODO(synk): banding over W is a small-C trick (~81% structural zeros at
        # C=8); at production channel counts switch to dense per-kh (3C, C) RHS.
        w_cat = band.reshape(3 * W * C, W * C).astype(jnp.bfloat16)
        s_t = jnp.tile(s, W)[None, :]                    # (1, W*C)
        t_t = jnp.tile(t, W)[None, :]
        return w_cat, s_t, t_t

    w1c, s1, t1 = fold(raw["w1"], raw["b1"], raw["g1"], raw["be1"],
                       raw["m1"], raw["v1"])
    w2c, s2, t2 = fold(raw["w2"], raw["b2"], raw["g2"], raw["be2"],
                       raw["m2"], raw["v2"])
    return (w1c, s1, t1, w2c, s2, t2)


# ----------------------------------------------------------------------------
# Pure-JAX f32 reference (module semantics)
# ----------------------------------------------------------------------------
def basic_block_reference(x_nhwc, raw):
    def conv_bn(x, w_oihw, b, gamma, beta, mean, var):
        C = w_oihw.shape[0]
        w_hwio = jnp.transpose(w_oihw, (2, 3, 1, 0))
        y = jax.lax.conv_general_dilated(
            x, w_hwio, window_strides=(1, 1), padding="SAME",
            dimension_numbers=("NHWC", "HWIO", "NHWC"))
        y = y + b.reshape(1, 1, 1, C)
        s = gamma / jnp.sqrt(var + _EPS)
        t = beta - mean * s
        return y * s.reshape(1, 1, 1, C) + t.reshape(1, 1, 1, C)

    h = jnp.maximum(conv_bn(x_nhwc, raw["w1"], raw["b1"], raw["g1"],
                            raw["be1"], raw["m1"], raw["v1"]), 0.0)
    h2 = conv_bn(h, raw["w2"], raw["b2"], raw["g2"],
                 raw["be2"], raw["m2"], raw["v2"])
    return jnp.maximum(h2 + x_nhwc, 0.0)


# ----------------------------------------------------------------------------
if __name__ == "__main__":
    key = jax.random.PRNGKey(0)
    k_x, k_p = jax.random.split(key)

    # inplanes = planes = 8 (identity residual requires equal channels);
    # W*C = 128 -> one vreg lane width; N=4 -> 2 images per grid step, 2 steps.
    N, C, H, W = 4, 8, 16, 16
    x_nchw = jax.random.normal(k_x, (N, C, H, W), jnp.float32)   # PyTorch NCHW
    x_nhwc = jnp.transpose(x_nchw, (0, 2, 3, 1))                 # kernel NHWC

    raw = make_raw_params(k_p, C)
    kparams = prepare_kernel_params(raw, W)

    out_nhwc = jax.block_until_ready(basic_block_pallas(x_nhwc, kparams))
    ref_nhwc = jax.block_until_ready(basic_block_reference(x_nhwc, raw))

    out_nchw = jnp.transpose(out_nhwc, (0, 3, 1, 2))
    assert out_nchw.shape == (N, C, H, W)

    # bf16 MXU operands with f32 accumulation vs pure-f32 reference.
    max_err = float(jnp.max(jnp.abs(out_nhwc - ref_nhwc)))
    assert jnp.allclose(out_nhwc, ref_nhwc, rtol=5e-2, atol=5e-2), max_err
    print("KERNEL_OK")
</pallas_src>

<mosaic_0001>
module attributes {stable_mosaic.version = 11 : i64} {
  func.func @_basic_block_kernel(%arg0: i32, %arg1: memref<32x128xf32, #tpu.memory_space<vmem>>, %arg2: memref<384x128xbf16, #tpu.memory_space<vmem>>, %arg3: memref<1x128xf32, #tpu.memory_space<vmem>>, %arg4: memref<1x128xf32, #tpu.memory_space<vmem>>, %arg5: memref<384x128xbf16, #tpu.memory_space<vmem>>, %arg6: memref<1x128xf32, #tpu.memory_space<vmem>>, %arg7: memref<1x128xf32, #tpu.memory_space<vmem>>, %arg8: memref<32x128xf32, #tpu.memory_space<vmem>>, %arg9: memref<34x128xf32, #tpu.memory_space<vmem>>, %arg10: memref<32x384xbf16, #tpu.memory_space<vmem>>) attributes {dimension_semantics = [#tpu.dimension_semantics<parallel>], iteration_bounds = array<i64: 2>, scalar_prefetch = 0 : i64, scratch_operands = 2 : i64, tpu.core_type = #tpu.core_type<tc>, window_params = [{transform_indices = @transform_0, window_bounds = array<i64: 32, 128>}, {pipeline_mode = #tpu.pipeline_mode<synchronous>, transform_indices = @transform_1, window_bounds = array<i64: 384, 128>}, {pipeline_mode = #tpu.pipeline_mode<synchronous>, transform_indices = @transform_2, window_bounds = array<i64: 1, 128>}, {pipeline_mode = #tpu.pipeline_mode<synchronous>, transform_indices = @transform_3, window_bounds = array<i64: 1, 128>}, {pipeline_mode = #tpu.pipeline_mode<synchronous>, transform_indices = @transform_4, window_bounds = array<i64: 384, 128>}, {pipeline_mode = #tpu.pipeline_mode<synchronous>, transform_indices = @transform_5, window_bounds = array<i64: 1, 128>}, {pipeline_mode = #tpu.pipeline_mode<synchronous>, transform_indices = @transform_6, window_bounds = array<i64: 1, 128>}, {transform_indices = @transform_7, window_bounds = array<i64: 32, 128>}]} {
    %0 = tpu.iota {dimensions = array<i32: 0>} : vector<32x128xi32>
    %c16_i32 = arith.constant 16 : i32
    %c0_i32 = arith.constant 0 : i32
    %1 = arith.cmpi eq, %c16_i32, %c0_i32 : i32
    %c1_i32 = arith.constant 1 : i32
    %2 = arith.select %1, %c1_i32, %c16_i32 : i32
    %3 = vector.broadcast %2 : i32 to vector<32x128xi32>
    %4 = arith.remsi %0, %3 : vector<32x128xi32>
    %c0_i32_0 = arith.constant 0 : i32
    %5 = vector.broadcast %c0_i32_0 : i32 to vector<32x128xi32>
    %6 = arith.cmpi ne, %4, %5 : vector<32x128xi32>
    %c0_i32_1 = arith.constant 0 : i32
    %7 = vector.broadcast %c0_i32_1 : i32 to vector<32x128xi32>
    %8 = arith.cmpi slt, %4, %7 : vector<32x128xi32>
    %c0_i32_2 = arith.constant 0 : i32
    %9 = arith.cmpi slt, %2, %c0_i32_2 : i32
    %10 = vector.broadcast %9 : i1 to vector<32x128xi1>
    %11 = vector.broadcast %10 : vector<32x128xi1> to vector<32x128xi1>
    %12 = arith.xori %8, %11 : vector<32x128xi1>
    %13 = arith.andi %12, %6 : vector<32x128xi1>
    %14 = vector.broadcast %2 : i32 to vector<32x128xi32>
    %15 = arith.addi %4, %14 : vector<32x128xi32>
    %16 = arith.select %13, %15, %4 : vector<32x128xi1>, vector<32x128xi32>
    %c0_i32_3 = arith.constant 0 : i32
    %17 = vector.broadcast %c0_i32_3 : i32 to vector<32x128xi32>
    %18 = arith.cmpi ne, %16, %17 : vector<32x128xi32>
    %c15_i32 = arith.constant 15 : i32
    %19 = vector.broadcast %c15_i32 : i32 to vector<32x128xi32>
    %20 = arith.cmpi ne, %16, %19 : vector<32x128xi32>
    %cst = arith.constant 0.000000e+00 : f32
    %21 = vector.broadcast %cst : f32 to vector<1x128xf32>
    %c0 = arith.constant 0 : index
    %c0_4 = arith.constant 0 : index
    %22 = vector.load %arg9[%c0, %c0_4] : memref<34x128xf32, #tpu.memory_space<vmem>>, vector<1x128xf32>
    tpu.vector_store %arg9[%c0, %c0_4], %21 {strides = array<i32>} : memref<34x128xf32, #tpu.memory_space<vmem>>, vector<1x128xf32>,
    %c33 = arith.constant 33 : index
    %c0_5 = arith.constant 0 : index
    %23 = vector.load %arg9[%c33, %c0_5] : memref<34x128xf32, #tpu.memory_space<vmem>>, vector<1x128xf32>
    tpu.vector_store %arg9[%c33, %c0_5], %21 {strides = array<i32>} : memref<34x128xf32, #tpu.memory_space<vmem>>, vector<1x128xf32>,
    %c0_6 = arith.constant 0 : index
    %c0_7 = arith.constant 0 : index
    %24 = vector.load %arg1[%c0_6, %c0_7] : memref<32x128xf32, #tpu.memory_space<vmem>>, vector<32x128xf32>
    %c1 = arith.constant 1 : index
    %c0_8 = arith.constant 0 : index
    %25 = vector.load %arg9[%c1, %c0_8] : memref<34x128xf32, #tpu.memory_space<vmem>>, vector<32x128xf32>
    tpu.vector_store %arg9[%c1, %c0_8], %24 {strides = array<i32>} : memref<34x128xf32, #tpu.memory_space<vmem>>, vector<32x128xf32>,
    %c0_9 = arith.constant 0 : index
    %c0_10 = arith.constant 0 : index
    %26 = vector.load %arg9[%c0_9, %c0_10] : memref<34x128xf32, #tpu.memory_space<vmem>>, vector<32x128xf32>
    %cst_11 = arith.constant 0.000000e+00 : f32
    %27 = vector.broadcast %cst_11 : f32 to vector<32x128xf32>
    %28 = arith.select %18, %26, %27 : vector<32x128xi1>, vector<32x128xf32>
    %c2 = arith.constant 2 : index
    %c0_12 = arith.constant 0 : index
    %29 = vector.load %arg9[%c2, %c0_12] : memref<34x128xf32, #tpu.memory_space<vmem>>, vector<32x128xf32>
    %cst_13 = arith.constant 0.000000e+00 : f32
    %30 = vector.broadcast %cst_13 : f32 to vector<32x128xf32>
    %31 = arith.select %20, %29, %30 : vector<32x128xi1>, vector<32x128xf32>
    %32 = arith.truncf %28 : vector<32x128xf32> to vector<32x128xbf16>
    %c0_14 = arith.constant 0 : index
    %c0_15 = arith.constant 0 : index
    %33 = vector.load %arg10[%c0_14, %c0_15] : memref<32x384xbf16, #tpu.memory_space<vmem>>, vector<32x128xbf16>
    tpu.vector_store %arg10[%c0_14, %c0_15], %32 {strides = array<i32>} : memref<32x384xbf16, #tpu.memory_space<vmem>>, vector<32x128xbf16>,
    %34 = arith.truncf %24 : vector<32x128xf32> to vector<32x128xbf16>
    %c0_16 = arith.constant 0 : index
    %c128 = arith.constant 128 : index
    %35 = vector.load %arg10[%c0_16, %c128] : memref<32x384xbf16, #tpu.memory_space<vmem>>, vector<32x128xbf16>
    tpu.vector_store %arg10[%c0_16, %c128], %34 {strides = array<i32>} : memref<32x384xbf16, #tpu.memory_space<vmem>>, vector<32x128xbf16>,
    %36 = arith.truncf %31 : vector<32x128xf32> to vector<32x128xbf16>
    %c0_17 = arith.constant 0 : index
    %c256 = arith.constant 256 : index
    %37 = vector.load %arg10[%c0_17, %c256] : memref<32x384xbf16, #tpu.memory_space<vmem>>, vector<32x128xbf16>
    tpu.vector_store %arg10[%c0_17, %c256], %36 {strides = array<i32>} : memref<32x384xbf16, #tpu.memory_space<vmem>>, vector<32x128xbf16>,
    %c0_18 = arith.constant 0 : index
    %c0_19 = arith.constant 0 : index
    %38 = vector.load %arg10[%c0_18, %c0_19] : memref<32x384xbf16, #tpu.memory_space<vmem>>, vector<32x384xbf16>
    %c0_20 = arith.constant 0 : index
    %c0_21 = arith.constant 0 : index
    %39 = vector.load %arg2[%c0_20, %c0_21] : memref<384x128xbf16, #tpu.memory_space<vmem>>, vector<384x128xbf16>
    %cst_22 = arith.constant dense<0.000000e+00> : vector<32x128xf32>
    %40 = tpu.matmul %38, %39, %cst_22 {dimension_numbers = #tpu.dot_dimension_numbers<[1], [0], [0], [1], [0, 0, 1, 1], [], []>} : vector<32x384xbf16>, vector<384x128xbf16>, vector<32x128xf32> -> vector<32x128xf32>
    %c0_23 = arith.constant 0 : index
    %c0_24 = arith.constant 0 : index
    %41 = vector.load %arg3[%c0_23, %c0_24] : memref<1x128xf32, #tpu.memory_space<vmem>>, vector<1x128xf32>
    %42 = vector.broadcast %41 : vector<1x128xf32> to vector<32x128xf32>
    %43 = arith.mulf %40, %42 : vector<32x128xf32>
    %c0_25 = arith.constant 0 : index
    %c0_26 = arith.constant 0 : index
    %44 = vector.load %arg4[%c0_25, %c0_26] : memref<1x128xf32, #tpu.memory_space<vmem>>, vector<1x128xf32>
    %45 = vector.broadcast %44 : vector<1x128xf32> to vector<32x128xf32>
    %46 = arith.addf %43, %45 : vector<32x128xf32>
    %cst_27 = arith.constant 0.000000e+00 : f32
    %47 = vector.broadcast %cst_27 : f32 to vector<32x128xf32>
    %48 = arith.maximumf %46, %47 : vector<32x128xf32>
    %c1_28 = arith.constant 1 : index
    %c0_29 = arith.constant 0 : index
    %49 = vector.load %arg9[%c1_28, %c0_29] : memref<34x128xf32, #tpu.memory_space<vmem>>, vector<32x128xf32>
    tpu.vector_store %arg9[%c1_28, %c0_29], %48 {strides = array<i32>} : memref<34x128xf32, #tpu.memory_space<vmem>>, vector<32x128xf32>,
    %c0_30 = arith.constant 0 : index
    %c0_31 = arith.constant 0 : index
    %50 = vector.load %arg9[%c0_30, %c0_31] : memref<34x128xf32, #tpu.memory_space<vmem>>, vector<32x128xf32>
    %cst_32 = arith.constant 0.000000e+00 : f32
    %51 = vector.broadcast %cst_32 : f32 to vector<32x128xf32>
    %52 = arith.select %18, %50, %51 : vector<32x128xi1>, vector<32x128xf32>
    %c2_33 = arith.constant 2 : index
    %c0_34 = arith.constant 0 : index
    %53 = vector.load %arg9[%c2_33, %c0_34] : memref<34x128xf32, #tpu.memory_space<vmem>>, vector<32x128xf32>
    %cst_35 = arith.constant 0.000000e+00 : f32
    %54 = vector.broadcast %cst_35 : f32 to vector<32x128xf32>
    %55 = arith.select %20, %53, %54 : vector<32x128xi1>, vector<32x128xf32>
    %56 = arith.truncf %52 : vector<32x128xf32> to vector<32x128xbf16>
    %c0_36 = arith.constant 0 : index
    %c0_37 = arith.constant 0 : index
    %57 = vector.load %arg10[%c0_36, %c0_37] : memref<32x384xbf16, #tpu.memory_space<vmem>>, vector<32x128xbf16>
    tpu.vector_store %arg10[%c0_36, %c0_37], %56 {strides = array<i32>} : memref<32x384xbf16, #tpu.memory_space<vmem>>, vector<32x128xbf16>,
    %58 = arith.truncf %48 : vector<32x128xf32> to vector<32x128xbf16>
    %c0_38 = arith.constant 0 : index
    %c128_39 = arith.constant 128 : index
    %59 = vector.load %arg10[%c0_38, %c128_39] : memref<32x384xbf16, #tpu.memory_space<vmem>>, vector<32x128xbf16>
    tpu.vector_store %arg10[%c0_38, %c128_39], %58 {strides = array<i32>} : memref<32x384xbf16, #tpu.memory_space<vmem>>, vector<32x128xbf16>,
    %60 = arith.truncf %55 : vector<32x128xf32> to vector<32x128xbf16>
    %c0_40 = arith.constant 0 : index
    %c256_41 = arith.constant 256 : index
    %61 = vector.load %arg10[%c0_40, %c256_41] : memref<32x384xbf16, #tpu.memory_space<vmem>>, vector<32x128xbf16>
    tpu.vector_store %arg10[%c0_40, %c256_41], %60 {strides = array<i32>} : memref<32x384xbf16, #tpu.memory_space<vmem>>, vector<32x128xbf16>,
    %c0_42 = arith.constant 0 : index
    %c0_43 = arith.constant 0 : index
    %62 = vector.load %arg10[%c0_42, %c0_43] : memref<32x384xbf16, #tpu.memory_space<vmem>>, vector<32x384xbf16>
    %c0_44 = arith.constant 0 : index
    %c0_45 = arith.constant 0 : index
    %63 = vector.load %arg5[%c0_44, %c0_45] : memref<384x128xbf16, #tpu.memory_space<vmem>>, vector<384x128xbf16>
    %cst_46 = arith.constant dense<0.000000e+00> : vector<32x128xf32>
    %64 = tpu.matmul %62, %63, %cst_46 {dimension_numbers = #tpu.dot_dimension_numbers<[1], [0], [0], [1], [0, 0, 1, 1], [], []>} : vector<32x384xbf16>, vector<384x128xbf16>, vector<32x128xf32> -> vector<32x128xf32>
    %c0_47 = arith.constant 0 : index
    %c0_48 = arith.constant 0 : index
    %65 = vector.load %arg6[%c0_47, %c0_48] : memref<1x128xf32, #tpu.memory_space<vmem>>, vector<1x128xf32>
    %66 = vector.broadcast %65 : vector<1x128xf32> to vector<32x128xf32>
    %67 = arith.mulf %64, %66 : vector<32x128xf32>
    %c0_49 = arith.constant 0 : index
    %c0_50 = arith.constant 0 : index
    %68 = vector.load %arg7[%c0_49, %c0_50] : memref<1x128xf32, #tpu.memory_space<vmem>>, vector<1x128xf32>
    %69 = vector.broadcast %68 : vector<1x128xf32> to vector<32x128xf32>
    %70 = arith.addf %67, %69 : vector<32x128xf32>
    %71 = arith.addf %70, %24 : vector<32x128xf32>
    %cst_51 = arith.constant 0.000000e+00 : f32
    %72 = vector.broadcast %cst_51 : f32 to vector<32x128xf32>
    %73 = arith.maximumf %71, %72 : vector<32x128xf32>
    %c0_52 = arith.constant 0 : index
    %c0_53 = arith.constant 0 : index
    %74 = vector.load %arg8[%c0_52, %c0_53] : memref<32x128xf32, #tpu.memory_space<vmem>>, vector<32x128xf32>
    tpu.vector_store %arg8[%c0_52, %c0_53], %73 {strides = array<i32>} : memref<32x128xf32, #tpu.memory_space<vmem>>, vector<32x128xf32>,
    return
  }
  func.func @transform_0(%arg0: i32) -> (i32, i32) {
    %c0_i32 = arith.constant 0 : i32
    %c0_i32_0 = arith.constant 0 : i32
    return %arg0, %c0_i32 : i32, i32
  }
  func.func @transform_1(%arg0: i32) -> (i32, i32) {
    %c0_i32 = arith.constant 0 : i32
    %c0_i32_0 = arith.constant 0 : i32
    %c0_i32_1 = arith.constant 0 : i32
    return %c0_i32, %c0_i32_0 : i32, i32
  }
  func.func @transform_2(%arg0: i32) -> (i32, i32) {
    %c0_i32 = arith.constant 0 : i32
    %c0_i32_0 = arith.constant 0 : i32
    %c0_i32_1 = arith.constant 0 : i32
    return %c0_i32, %c0_i32_0 : i32, i32
  }
  func.func @transform_3(%arg0: i32) -> (i32, i32) {
    %c0_i32 = arith.constant 0 : i32
    %c0_i32_0 = arith.constant 0 : i32
    %c0_i32_1 = arith.constant 0 : i32
    return %c0_i32, %c0_i32_0 : i32, i32
  }
  func.func @transform_4(%arg0: i32) -> (i32, i32) {
    %c0_i32 = arith.constant 0 : i32
    %c0_i32_0 = arith.constant 0 : i32
    %c0_i32_1 = arith.constant 0 : i32
    return %c0_i32, %c0_i32_0 : i32, i32
  }
  func.func @transform_5(%arg0: i32) -> (i32, i32) {
    %c0_i32 = arith.constant 0 : i32
    %c0_i32_0 = arith.constant 0 : i32
    %c0_i32_1 = arith.constant 0 : i32
    return %c0_i32, %c0_i32_0 : i32, i32
  }
  func.func @transform_6(%arg0: i32) -> (i32, i32) {
    %c0_i32 = arith.constant 0 : i32
    %c0_i32_0 = arith.constant 0 : i32
    %c0_i32_1 = arith.constant 0 : i32
    return %c0_i32, %c0_i32_0 : i32, i32
  }
  func.func @transform_7(%arg0: i32) -> (i32, i32) {
    %c0_i32 = arith.constant 0 : i32
    %c0_i32_0 = arith.constant 0 : i32
    return %arg0, %c0_i32 : i32, i32
  }
}

</mosaic_0001>

<bundles_post_ra>
// kernel: _basic_block_pallas.1
= control target key start
LH: loop header
LB: loop body
LE: loop exit
PB: predicated region body
PF: predicated region fallthrough
CT: control target
= control target key end

     0   :  { %s1433_s24 = smov 0   ;;  %s1675_s0 = inlined_call_operand.vmem [shape: f32[64,128], index: 0, kind: input, shape index: {}]   ;;  %s1676_s1 = inlined_call_operand.vmem [shape: bf16[384,128], index: 1, kind: input, shape index: {}]   ;;  %s1677_s2 = inlined_call_operand.vmem [shape: f32[1,128], index: 2, kind: input, shape index: {}]   ;;  %s1678_s3 = inlined_call_operand.vmem [shape: f32[1,128], index: 3, kind: input, shape index: {}]   ;;  %s1679_s4 = inlined_call_operand.vmem [shape: bf16[384,128], index: 4, kind: input, shape index: {}]   ;;  %s1680_s5 = inlined_call_operand.vmem [shape: f32[1,128], index: 5, kind: input, shape index: {}]   ;;  %s1681_s6 = inlined_call_operand.vmem [shape: f32[1,128], index: 6, kind: input, shape index: {}]   ;;  %s1682_s7 = inlined_call_operand.vmem [shape: f32[64,128], index: 7, kind: output, shape index: {}]  }
   0x1 LB: > { %s1122_s25 = sadd.s32 4294967295, %s1389_s24   ;;  %p1126_p0 = scmp.ge.s32.totalorder %s1389_s24, 1  ;;  %s1389_s24 = sphi %s1433_s24, %s17_s24  }
   0x2   : > { %p238_p1 = scmp.lt.s32.totalorder %s1389_s24, 3 }
   0x4   : > { %p239_p2 = pnand %p1126_p0, %p238_p1 }
   0x5   : > { %v1335_v0 = vld [vmem:[%s1676_s1 + $0x40] sm:$0xff] (!%p239_p2)   ;;  %v1338_v3 = vld [vmem:[%s1676_s1 + $0x48] sm:$0xff] (!%p239_p2)   ;;  %v1341_v6 = vld [vmem:[%s1676_s1 + $0x50] sm:$0xff] (!%p239_p2)   ;;  %s1127_s17 = sshll.u32 (!%p239_p2), %s1122_s25, 2  ;;  %v283_v9 = vlaneseq (!%p239_p2)  ;;  %v1391_v13 = vmov (!%p239_p2), 0.0   ;;  %vm1392_vm2 = vmmov (!%p239_p2), 1  }
   0x6   : > { %242 = sbr.rel (%p239_p2) target bundleno = 510 (0x1fe), region = 48  ;;  %v1336_v1 = vld [vmem:[%s1676_s1 + $0x80] sm:$0xff] (!%p239_p2)   ;;  %1209 = vmatprep.subr.bf16.mxu0 (!%p239_p2), %v1335_v0  ;;  %v1339_v4 = vld [vmem:[%s1676_s1 + $0x88] sm:$0xff] (!%p239_p2)   ;;  %v1342_v7 = vld [vmem:[%s1676_s1 + $0x90] sm:$0xff] (!%p239_p2)   ;;  %p271_p3 = scmp.lt.s32.totalorder (!%p239_p2), %s1127_s17, 7 }
   0x7   : > { %v1337_v2 = vld [vmem:[%s1676_s1] sm:$0xff] (!%p239_p2)   ;;  %1285 = vmatprep.subr.bf16.mxu1 (!%p239_p2), %v1336_v1  ;;  %v1340_v5 = vld [vmem:[%s1676_s1 + $0x8] sm:$0xff] (!%p239_p2)   ;;  %v1343_v8 = vld [vmem:[%s1676_s1 + $0x10] sm:$0xff] (!%p239_p2)   ;;  %344 = vst [vmem:[#allocation2] sm:$0x1] (!%p239_p2), %v1391_v13  ;;  %v284_v15 = vshrl.u32 (!%p239_p2), %v283_v9, 7 }
   0x8   : > { %1210 = vmatpush3.bf16.msra.mxu0 (!%p239_p2), %v1337_v2  ;;  %1286 = vmatpush3.bf16.msra.mxu1 (!%p239_p2), %v1336_v1  ;;  %v1344_v10 = vld [vmem:[%s1676_s1 + $0x58] sm:$0xff] (!%p239_p2)   ;;  %345 = vst [vmem:[#allocation2 + $0x21] sm:$0x1] (!%p239_p2), %v1391_v13  ;;  %v1347_v14 = vld [vmem:[%s1676_s1 + $0x60] sm:$0xff] (!%p239_p2)   ;;  %v1350_v18 = vld [vmem:[%s1676_s1 + $0x68] sm:$0xff] (!%p239_p2)  }
   0x9   : > { %1211 = vmatprep.subr.bf16.mxu0 (!%p239_p2), %v1338_v3  ;;  %1287 = vmatprep.subr.bf16.mxu1 (!%p239_p2), %v1339_v4  ;;  %v1345_v11 = vld [vmem:[%s1676_s1 + $0x98] sm:$0xff] (!%p239_p2)   ;;  %v1348_v16 = vld [vmem:[%s1676_s1 + $0xa0] sm:$0xff] (!%p239_p2)   ;;  %v285_v19 = vadd.s32 (!%p239_p2), 8, %v284_v15  ;;  %v1351_v20 = vld [vmem:[%s1676_s1 + $0xa8] sm:$0xff] (!%p239_p2)   ;;  %v287_v22 = vadd.s32 (!%p239_p2), 24, %v284_v15  ;;  %v292_v26 = vand.u32 (!%p239_p2), 15, %v284_v15 }
   0xa   : > { %v1346_v12 = vld [vmem:[%s1676_s1 + $0x18] sm:$0xff] (!%p239_p2)   ;;  %v1349_v17 = vld [vmem:[%s1676_s1 + $0x20] sm:$0xff] (!%p239_p2)   ;;  %v1352_v21 = vld [vmem:[%s1676_s1 + $0x28] sm:$0xff] (!%p239_p2)   ;;  %v286_v28 = vadd.s32 (!%p239_p2), 16, %v284_v15 }
   0xb   : > { %v1353_v23 = vld [vmem:[%s1676_s1 + $0x70] sm:$0xff] (!%p239_p2)   ;;  %v299_v24 = vand.u32 (!%p239_p2), 15, %v285_v19  ;;  %v1356_v29 = vld [vmem:[%s1676_s1 + $0x78] sm:$0xff] (!%p239_p2)   ;;  %v313_v30 = vand.u32 (!%p239_p2), 15, %v287_v22  ;;  %vm336_vm1 = vcmp.ne.s32.totalorder (!%p239_p2), %v292_v26, 0  ;;  %v1359_v41 = vld [vmem:[%s1679_s4 + $0x40] sm:$0xff] (!%p239_p2)  }
   0xc   : > { %1212 = vmatpush3.bf16.msra.mxu0 (!%p239_p2), %v1340_v5  ;;  %1288 = vmatpush3.bf16.msra.mxu1 (!%p239_p2), %v1339_v4  ;;  %v1354_v25 = vld [vmem:[%s1676_s1 + $0xb0] sm:$0xff] (!%p239_p2)   ;;  %v1357_v34 = vld [vmem:[%s1676_s1 + $0xb8] sm:$0xff] (!%p239_p2)   ;;  %v306_v37 = vand.u32 (!%p239_p2), 15, %v286_v28  ;;  %vm1541_vm5 = vmpackc.low (!%p239_p2), %vm1392_vm2, %vm336_vm1 }
   0xd   : > { %1213 = vmatprep.subr.bf16.mxu0 %v1341_v6  ;;  %1289 = vmatprep.subr.bf16.mxu1 %v1342_v7  ;;  %s1694_s17 = smov (!%p271_p3, %s1127_s17), 7  ;;  %v1355_v27 = vld [vmem:[%s1676_s1 + $0x30] sm:$0xff]   ;;  %vm341_vm0 = vcmp.ne.s32.totalorder %v299_v24, 15  ;;  %vm343_vm4 = vcmp.ne.s32.totalorder %v313_v30, 15  ;;  %v1358_v39 = vld [vmem:[%s1676_s1 + $0x38] sm:$0xff]   ;;  %v1360_v44 = vld [vmem:[%s1679_s4] sm:$0xff]  }
   0xe   : > { %s1128_s16 = sshll.u32 %s1694_s17, 3  ;;  %vm1533_vm3 = vmpackc.low %vm341_vm0, %vm1392_vm2  ;;  %vm1553_vm7 = vcmp.ne.s32.totalorder %v306_v37, 0  ;;  %v1361_v56 = vld [vmem:[%s1679_s4 + $0x48] sm:$0xff]   ;;  %v1363_v61 = vld [vmem:[%s1679_s4 + $0x50] sm:$0xff]  }
   0xf   : > { %s274_s27 = scalar_lea.vmem %s1675_s0, %s1128_s16  ;;  %vm1549_vm6 = vmpackc.low %vm343_vm4, %vm1392_vm2  ;;  %v1362_v59 = vld [vmem:[%s1679_s4 + $0x8] sm:$0xff]   ;;  %v1364_v62 = vld [vmem:[%s1679_s4 + $0x80] sm:$0xff]   ;;  %s280_s11 = scalar_lea.vmem %s1682_s7, %s1128_s16 }
  0x10   : > { %1214 = vmatpush3.bf16.msra.mxu0 %v1343_v8  ;;  %1290 = vmatpush3.bf16.msra.mxu1 %v1342_v7  ;;  %v1515_v31 = vld [vmem:[%s274_s27] sm:$0xff]  ;;  %v1517_v32 = vld [vmem:[%s274_s27 + $0x8] sm:$0xff]  ;;  %v1519_v33 = vld [vmem:[%s274_s27 + $0x10] sm:$0xff] }
  0x11   : > { %1215 = vmatprep.subr.bf16.mxu0 %v1344_v10  ;;  %1291 = vmatprep.subr.bf16.mxu1 %v1345_v11  ;;  %v1524_v35 = vld [vmem:[%s274_s27 + $0x18] sm:$0xff]  ;;  %350 = vst [vmem:[#allocation2 + $0x1] sm:$0xff] %v1515_v31  ;;  %351 = vst [vmem:[#allocation2 + $0x9] sm:$0xff] %v1517_v32  ;;  %v374_v36 = vpack.c.bf16 %v1517_v32, %v1515_v31  ;;  %v1365_v63 = vld [vmem:[%s1679_s4 + $0x10] sm:$0xff]  }
  0x12   : > { %352 = vst [vmem:[#allocation2 + $0x11] sm:$0xff] %v1519_v33  ;;  %353 = vst [vmem:[#allocation2 + $0x19] sm:$0xff] %v1524_v35  ;;  %v375_v52 = vpack.c.bf16 %v1524_v35, %v1519_v33  ;;  %v1366_v0 = vld [vmem:[%s1679_s4 + $0x58] sm:$0xff]   ;;  %v1367_v1 = vld [vmem:[%s1679_s4 + $0x88] sm:$0xff]  }
  0x13   : > { %612 = vmatprep.mubr.bf16.mxu0 %v374_v36  ;;  %vm1565_vm8 = vmpackc.low %vm1392_vm2, %vm1553_vm7  ;;  %v1368_v2 = vld [vmem:[%s1679_s4 + $0x18] sm:$0xff]   ;;  %v1369_v3 = vld [vmem:[%s1679_s4 + $0x60] sm:$0xff]  }
  0x14   : > { %1216 = vmatpush3.bf16.msra.mxu0 %v1346_v12  ;;  %1292 = vmatpush3.bf16.msra.mxu1 %v1345_v11  ;;  %v1370_v4 = vld [vmem:[%s1679_s4 + $0x90] sm:$0xff]   ;;  %v1371_v5 = vld [vmem:[%s1679_s4 + $0x20] sm:$0xff]   ;;  %v1372_v6 = vld [vmem:[%s1679_s4 + $0x68] sm:$0xff]  }
  0x15   : > { %1217 = vmatprep.subr.bf16.mxu0 %v1347_v14  ;;  %1293 = vmatprep.subr.bf16.mxu1 %v1348_v16  ;;  %v1373_v7 = vld [vmem:[%s1679_s4 + $0x98] sm:$0xff]   ;;  %v1374_v8 = vld [vmem:[%s1679_s4 + $0x28] sm:$0xff]   ;;  %v1375_v9 = vld [vmem:[%s1679_s4 + $0x70] sm:$0xff]  }
  0x16   : > { %v1376_v10 = vld [vmem:[%s1679_s4 + $0xa0] sm:$0xff]   ;;  %v1377_v11 = vld [vmem:[%s1679_s4 + $0x30] sm:$0xff]   ;;  %v1378_v12 = vld [vmem:[%s1679_s4 + $0x78] sm:$0xff]  }
  0x17   : > { %v1379_v13 = vld [vmem:[%s1679_s4 + $0xa8] sm:$0xff]   ;;  %v1380_v14 = vld [vmem:[%s1679_s4 + $0x38] sm:$0xff]   ;;  %v1381_v15 = vld [vmem:[%s1679_s4 + $0xb0] sm:$0xff]  }
  0x18   : > { %1218 = vmatpush3.bf16.msra.mxu0 %v1349_v17  ;;  %1294 = vmatpush3.bf16.msra.mxu1 %v1348_v16  ;;  %v362_v45 = vld [vmem:[#allocation2 + $0x2] sm:$0xff]  ;;  %v1382_v16 = vld [vmem:[%s1679_s4 + $0xb8] sm:$0xff]   ;;  %v1155_v24 = vld [vmem:[%s1677_s2] ss:$0 sm:$0xff] }
  0x19   : > { %1219 = vmatprep.subr.bf16.mxu0 %v1350_v18  ;;  %1295 = vmatprep.subr.bf16.mxu1 %v1351_v20  ;;  %v363_v46 = vld [vmem:[#allocation2 + $0xa] sm:$0xff]  ;;  %v354_v47 = vld [vmem:[#allocation2] sm:$0xff]  ;;  %v364_v50 = vld [vmem:[#allocation2 + $0x12] sm:$0xff] }
  0x1a   : > { %v1192_v48 = vpack.c.bf16 %v363_v46, %v362_v45  ;;  %v355_v49 = vld [vmem:[#allocation2 + $0x8] sm:$0xff]  ;;  %v365_v51 = vld [vmem:[#allocation2 + $0x1a] sm:$0xff]  ;;  %v356_v57 = vld [vmem:[#allocation2 + $0x10] sm:$0xff] }
  0x1b   : > { %v1186_v53 = vpack.c.bf16 %v355_v49, %v354_v47  ;;  %v1195_v54 = vpack.c.bf16 %v365_v51, %v364_v50  ;;  %v357_v58 = vld [vmem:[#allocation2 + $0x18] sm:$0xff]  ;;  %v1181_v38 = vld [vmem:[%s1680_s5] ss:$0 sm:$0xff] }
  0x1c   : > { %1220 = vmatpush3.bf16.msra.mxu0 %v1352_v21  ;;  %1296 = vmatpush3.bf16.msra.mxu1 %v1351_v20  ;;  %v1189_v60 = vpack.c.bf16 %v357_v58, %v356_v57  ;;  %v1182_v42 = vld [vmem:[%s1681_s6] ss:$0 sm:$0xff] }
  0x1d   : > { %1221 = vmatprep.subr.bf16.mxu0 %v1353_v23  ;;  %1297 = vmatprep.subr.bf16.mxu1 %v1354_v25 }
  0x1e   : > { %1301 = vmatprep.mubr.msk.bf16.mxu1 %vm1533_vm3, %v1192_v48 }
  0x20   : > { %1222 = vmatpush3.bf16.msra.mxu0 %v1355_v27  ;;  %1298 = vmatpush3.bf16.msra.mxu1 %v1354_v25 }
  0x21   : > { %1223 = vmatprep.subr.bf16.mxu0 %v1356_v29  ;;  %1299 = vmatprep.subr.bf16.mxu1 %v1357_v34  ;;  %v1156_v29 = vld [vmem:[%s1678_s3] ss:$0 sm:$0xff] }
  0x24   : > { %1224 = vmatpush3.bf16.msra.mxu0 %v1358_v39  ;;  %1300 = vmatpush3.bf16.msra.mxu1 %v1357_v34 }
  0x25   : > { %1247 = vmatprep.subr.bf16.mxu0 %v1359_v41  ;;  %1305 = vmatprep.subr.bf16.mxu1 %v1364_v62 }
  0x27   : > { %1187 = vmatmul.mubr.msk.bf16.vlgmr.msra.gmra.mrb[0].mxu0 %vm1541_vm5, %v1186_v53  ;;  %1302 = vmatmul.mubr.msk.bf16.vlgmr.msra.gmra.mrb[0].mxu1 %vm1549_vm6, %v1195_v54 }
  0x28   : > { %620 = vmatprep.mubr.bf16.mxu0 %v375_v52  ;;  %1248 = vmatpush3.bf16.msra.mxu0 %v1360_v44 }
  0x29   : > { %1249 = vmatprep.subr.bf16.mxu0 %v1361_v56  ;;  %1306 = vmatpush3.bf16.msra.mxu1 %v1364_v62 }
  0x2a   : > { %1307 = vmatprep.subr.bf16.mxu1 %v1367_v1 }
  0x2c   : > { %1250 = vmatpush3.bf16.msra.mxu0 %v1362_v59 }
  0x2d   : > { %1251 = vmatprep.subr.bf16.mxu0 %v1363_v61  ;;  %1308 = vmatpush3.bf16.msra.mxu1 %v1367_v1 }
  0x2e   : > { %1309 = vmatprep.subr.bf16.mxu1 %v1370_v4 }
  0x2f   : > { %1190 = vmatmul.mubr.msk.bf16.gmra.mrb[4].mxu0 %vm1565_vm8, %v1189_v60 }
  0x30   : > { %1252 = vmatpush3.bf16.msra.mxu0 %v1365_v63 }
  0x31   : > { %1253 = vmatprep.subr.bf16.mxu0 %v1366_v0  ;;  %1310 = vmatpush3.bf16.msra.mxu1 %v1370_v4 }
  0x32   : > { %1311 = vmatprep.subr.bf16.mxu1 %v1373_v7 }
  0x34   : > { %1254 = vmatpush3.bf16.msra.mxu0 %v1368_v2 }
  0x35   : > { %1255 = vmatprep.subr.bf16.mxu0 %v1369_v3  ;;  %1312 = vmatpush3.bf16.msra.mxu1 %v1373_v7 }
  0x36   : > { %1313 = vmatprep.subr.bf16.mxu1 %v1376_v10 }
  0x38   : > { %1256 = vmatpush3.bf16.msra.mxu0 %v1371_v5 }
  0x39   : > { %1257 = vmatprep.subr.bf16.mxu0 %v1372_v6  ;;  %1314 = vmatpush3.bf16.msra.mxu1 %v1376_v10 }
  0x3a   : > { %1315 = vmatprep.subr.bf16.mxu1 %v1379_v13 }
  0x3c   : > { %1258 = vmatpush3.bf16.msra.mxu0 %v1374_v8 }
  0x3d   : > { %1259 = vmatprep.subr.bf16.mxu0 %v1375_v9  ;;  %1316 = vmatpush3.bf16.msra.mxu1 %v1379_v13 }
  0x3e   : > { %1317 = vmatprep.subr.bf16.mxu1 %v1381_v15 }
  0x40   : > { %1260 = vmatpush3.bf16.msra.mxu0 %v1377_v11 }
  0x41   : > { %1261 = vmatprep.subr.bf16.mxu0 %v1378_v12  ;;  %1318 = vmatpush3.bf16.msra.mxu1 %v1381_v15 }
  0x42   : > { %1319 = vmatprep.subr.bf16.mxu1 %v1382_v16 }
  0x44   : > { %1262 = vmatpush3.bf16.msra.mxu0 %v1380_v14 }
  0x45   : > { %1320 = vmatpush3.bf16.msra.mxu1 %v1382_v16 }
  0xfa   : > { %v1225_v17 = vpop.f32.mrb[0].mxu0  ;;  %v1303_v18 = vpop.f32.mrb[0].mxu1 }
  0xfb   : > { %v1226_v19 = vpop.f32.mrb[1].mxu0  ;;  %v663_v20 = vpop.f32.mrb[1].mxu1 }
  0xfc   : > { %v1227_v21 = vadd.f32 %v1226_v19, %v1225_v17  ;;  %v1228_v22 = vpop.f32.mrb[2].mxu0  ;;  %v1304_v23 = vpop.f32.mrb[2].mxu1 }
  0xfd   : > { %v1229_v25 = vpop.f32.mrb[3].mxu0  ;;  %v666_v26 = vpop.f32.mrb[3].mxu1 }
  0xfe   : > { %v664_v27 = vadd.f32 %v1227_v21, %v663_v20  ;;  %v1230_v28 = vadd.f32 %v1229_v25, %v1228_v22 }
 0x100   : > { %v685_v30 = vmul.f32 %v1155_v24, %v664_v27  ;;  %v667_v34 = vadd.f32 %v1230_v28, %v666_v26 }
 0x102   : > { %v696_v36 = vadd.f32 %v1156_v29, %v685_v30  ;;  %v686_v37 = vmul.f32 %v1155_v24, %v667_v34  ;;  %v1231_v39 = vpop.f32.mrb[4].mxu0 }
 0x103   : > { %v1232_v41 = vpop.f32.mrb[5].mxu0 }
 0x104   : > { %v700_v43 = vmax.f32 %v696_v36, 0.0  ;;  %v697_v44 = vadd.f32 %v1156_v29, %v686_v37  ;;  %v1233_v45 = vadd.f32 %v1232_v41, %v1231_v39  ;;  %v1234_v46 = vpop.f32.mrb[6].mxu0 }
 0x105   : > { %v1235_v47 = vpop.f32.mrb[7].mxu0 }
 0x106   : > { %704 = vst [vmem:[#allocation2 + $0x1] sm:$0xff] %v700_v43  ;;  %v701_v48 = vmax.f32 %v697_v44, 0.0  ;;  %v672_v49 = vadd.f32 %v1303_v18, %v1233_v45  ;;  %v1236_v50 = vadd.f32 %v1235_v47, %v1234_v46 }
 0x108   : > { %705 = vst [vmem:[#allocation2 + $0x9] sm:$0xff] %v701_v48  ;;  %v687_v51 = vmul.f32 %v1155_v24, %v672_v49  ;;  %v675_v52 = vadd.f32 %v1304_v23, %v1236_v50  ;;  %v728_v53 = vpack.c.bf16 %v701_v48, %v700_v43 }
 0x10a   : > { %v688_v54 = vmul.f32 %v1155_v24, %v675_v52  ;;  %966 = vmatprep.mubr.bf16.mxu0 %v728_v53  ;;  %v698_v56 = vadd.f32 %v1156_v29, %v687_v51 }
 0x10c   : > { %v699_v57 = vadd.f32 %v1156_v29, %v688_v54  ;;  %v702_v58 = vmax.f32 %v698_v56, 0.0 }
 0x10d   : > { %v708_v60 = vld [vmem:[#allocation2] sm:$0xff] }
 0x10e   : > { %v703_v59 = vmax.f32 %v699_v57, 0.0  ;;  %706 = vst [vmem:[#allocation2 + $0x11] sm:$0xff] %v702_v58 }
 0x10f   : > { %v709_v61 = vld [vmem:[#allocation2 + $0x8] sm:$0xff] }
 0x110   : > { %v1198_v62 = vpack.c.bf16 %v709_v61, %v708_v60  ;;  %707 = vst [vmem:[#allocation2 + $0x19] sm:$0xff] %v703_v59  ;;  %v729_v63 = vpack.c.bf16 %v703_v59, %v702_v58  ;;  %v716_v0 = vld [vmem:[#allocation2 + $0x2] sm:$0xff] }
 0x112   : > { %1199 = vmatmul.mubr.msk.bf16.vlgmr.msra.gmra.mrb[8].mxu0 %vm1541_vm5, %v1198_v62 }
 0x113   : > { %974 = vmatprep.mubr.bf16.mxu0 %v729_v63 }
 0x115   : > { %v717_v1 = vld [vmem:[#allocation2 + $0xa] sm:$0xff] }
 0x116   : > { %v1204_v2 = vpack.c.bf16 %v717_v1, %v716_v0  ;;  %v710_v3 = vld [vmem:[#allocation2 + $0x10] sm:$0xff] }
 0x117   : > { %v711_v4 = vld [vmem:[#allocation2 + $0x18] sm:$0xff] }
 0x118   : > { %v718_v5 = vld [vmem:[#allocation2 + $0x12] sm:$0xff]  ;;  %v719_v6 = vld [vmem:[#allocation2 + $0x1a] sm:$0xff]  ;;  %1321 = vmatprep.mubr.msk.bf16.mxu1 %vm1533_vm3, %v1204_v2  ;;  %v1201_v7 = vpack.c.bf16 %v711_v4, %v710_v3 }
 0x119   : > { %v1207_v8 = vpack.c.bf16 %v719_v6, %v718_v5 }
 0x11a   : > { %1202 = vmatmul.mubr.msk.bf16.gmra.mrb[12].mxu0 %vm1565_vm8, %v1201_v7 }
 0x11b   : > { %1322 = vmatmul.mubr.msk.bf16.vlgmr.msra.gmra.mrb[4].mxu1 %vm1549_vm6, %v1207_v8 }
 0x1e5   : > { %v1263_v40 = vpop.f32.mrb[8].mxu0 }
 0x1e6   : > { %v1264_v9 = vpop.f32.mrb[9].mxu0 }
 0x1e7   : > { %v1265_v10 = vadd.f32 %v1264_v9, %v1263_v40  ;;  %v1266_v11 = vpop.f32.mrb[10].mxu0 }
 0x1e8   : > { %v1267_v12 = vpop.f32.mrb[11].mxu0 }
 0x1e9   : > { %v1268_v13 = vadd.f32 %v1267_v12, %v1266_v11 }
 0x1ed   : > { %v1269_v14 = vpop.f32.mrb[12].mxu0 }
 0x1ee   : > { %v1323_v15 = vpop.f32.mrb[4].mxu1  ;;  %v1270_v16 = vpop.f32.mrb[13].mxu0 }
 0x1ef   : > { %v1017_v17 = vpop.f32.mrb[5].mxu1  ;;  %v1271_v18 = vadd.f32 %v1270_v16, %v1269_v14  ;;  %v1272_v19 = vpop.f32.mrb[14].mxu0 }
 0x1f0   : > { %v1018_v55 = vadd.f32 %v1265_v10, %v1017_v17  ;;  %v1324_v20 = vpop.f32.mrb[6].mxu1  ;;  %v1273_v21 = vpop.f32.mrb[15].mxu0 }
 0x1f1   : > { %v1020_v22 = vpop.f32.mrb[7].mxu1  ;;  %v1026_v23 = vadd.f32 %v1323_v15, %v1271_v18  ;;  %v1274_v25 = vadd.f32 %v1273_v21, %v1272_v19 }
 0x1f2   : > { %v1039_v24 = vmul.f32 %v1181_v38, %v1018_v55  ;;  %v1021_v26 = vadd.f32 %v1268_v13, %v1020_v22 }
 0x1f3   : > { %v1041_v27 = vmul.f32 %v1181_v38, %v1026_v23  ;;  %v1029_v29 = vadd.f32 %v1324_v20, %v1274_v25 }
 0x1f4   : > { %v1050_v28 = vadd.f32 %v1182_v42, %v1039_v24  ;;  %v1040_v30 = vmul.f32 %v1181_v38, %v1021_v26 }
 0x1f5   : > { %v1052_v34 = vadd.f32 %v1182_v42, %v1041_v27  ;;  %v1042_v37 = vmul.f32 %v1181_v38, %v1029_v29 }
 0x1f6   : > { %v1054_v36 = vadd.f32 %v1050_v28, %v1515_v31  ;;  %v1051_v39 = vadd.f32 %v1182_v42, %v1040_v30 }
 0x1f7   : > { %v1056_v41 = vadd.f32 %v1052_v34, %v1519_v33  ;;  %v1053_v44 = vadd.f32 %v1182_v42, %v1042_v37 }
 0x1f8   : > { %v1058_v43 = vmax.f32 %v1054_v36, 0.0  ;;  %v1055_v45 = vadd.f32 %v1051_v39, %v1517_v32 }
 0x1f9   : > { %v1060_v46 = vmax.f32 %v1056_v41, 0.0  ;;  %v1057_v47 = vadd.f32 %v1053_v44, %v1524_v35 }
 0x1fa   : > { %1062 = vst [vmem:[%s280_s11] sm:$0xff] %v1058_v43  ;;  %v1059_v48 = vmax.f32 %v1055_v45, 0.0 }
 0x1fb   : > { %v1061_v49 = vmax.f32 %v1057_v47, 0.0  ;;  %1064 = vst [vmem:[%s280_s11 + $0x10] sm:$0xff] %v1060_v46 }
 0x1fc   : > { %1063 = vst [vmem:[%s280_s11 + $0x8] sm:$0xff] %v1059_v48 }
 0x1fd   : > { %1065 = vst [vmem:[%s280_s11 + $0x18] sm:$0xff] %v1061_v49 }
 0x1fe PF: > { %s17_s24 = sadd.s32 1, %s1389_s24  }
 0x1ff   : > { %p14_p4 = scmp.ge.s32.totalorder %s17_s24, 4  }
 0x201   :  { %16 = sbr.rel (!%p14_p4) target bundleno = 1 (0x1), region = 78 }

</bundles_post_ra>
